<compile_context>
chip_gen: v7x
topology: tpu7x:2x2x1
jax: 0.10.0
libtpu: 0.0.40
codegen_flags: <defaults>
</compile_context>

<pallas_src>
import functools

import jax
import jax.numpy as jnp
from jax.experimental import pallas as pl
from jax.experimental.pallas import tpu as pltpu

_LANES = 128
# ~4 MiB per block; in+out, each double-buffered => ~16 MiB pipelined VMEM.
_TARGET_BLOCK_BYTES = 4 * 1024 * 1024


def _sublane_quantum(dtype) -> int:
    # Sub-32-bit dtypes pack along sublanes: f32 -> 8, bf16 -> 16, int8/fp8 -> 32.
    itemsize = jnp.dtype(dtype).itemsize
    return max(8, 32 // itemsize)


def _leaky_relu_kernel_max(x_ref, o_ref, *, alpha: float):
    # Valid for 0 <= alpha <= 1: leaky_relu(x) == max(x, alpha * x).
    x = x_ref[...]
    o_ref[...] = jnp.maximum(x, x * jnp.asarray(alpha, x.dtype))


def _leaky_relu_kernel_where(x_ref, o_ref, *, alpha: float):
    x = x_ref[...]
    o_ref[...] = jnp.where(x >= 0, x, x * jnp.asarray(alpha, x.dtype))


def leaky_relu(x: jax.Array, alpha: float = 0.01) -> jax.Array:
    """LeakyReLU: y = x if x >= 0 else alpha * x. Any shape, floating dtypes."""
    orig_shape = x.shape
    dtype = x.dtype
    n = x.size
    if n == 0:
        return x

    flat = jnp.ravel(x)

    # Pad only when the total size is not a multiple of the 128-lane width
    # (rare for real activation tensors).  Ragged row counts are handled by a
    # cdiv grid with a padded partial last block, not by padding the array.
    padded_n = pl.cdiv(n, _LANES) * _LANES
    ragged = padded_n != n
    if ragged:
        flat = jnp.pad(flat, (0, padded_n - n))
    rows = padded_n // _LANES
    x2d = flat.reshape(rows, _LANES)

    itemsize = jnp.dtype(dtype).itemsize
    quantum = _sublane_quantum(dtype)
    target_tr = (_TARGET_BLOCK_BYTES // (_LANES * itemsize)) // quantum * quantum
    target_tr = max(target_tr, quantum)

    if rows <= target_tr:
        # Single block equal to the full array extent (always a legal block shape).
        tr = rows
    else:
        # Multiple of the sublane quantum; Pallas pads the partial last block.
        tr = target_tr

    grid = (pl.cdiv(rows, tr),)

    use_max = 0.0 <= alpha <= 1.0
    kernel = functools.partial(
        _leaky_relu_kernel_max if use_max else _leaky_relu_kernel_where,
        alpha=alpha,
    )

    out2d = pl.pallas_call(
        kernel,
        out_shape=jax.ShapeDtypeStruct((rows, _LANES), dtype),
        grid_spec=pltpu.PrefetchScalarGridSpec(
            num_scalar_prefetch=0,
            grid=grid,
            in_specs=[pl.BlockSpec((tr, _LANES), lambda i: (i, 0))],
            out_specs=pl.BlockSpec((tr, _LANES), lambda i: (i, 0)),
        ),
        compiler_params=pltpu.CompilerParams(
            dimension_semantics=("parallel",),
            vmem_limit_bytes=32 * 1024 * 1024,
        ),
    )(x2d)

    out_flat = out2d.reshape(-1)
    if ragged:
        out_flat = out_flat[:n]
    return out_flat.reshape(orig_shape)


if __name__ == "__main__":
    key = jax.random.PRNGKey(0)
    alpha = 0.01

    # Small NCHW input consistent with a typical conv-net activation.
    x = jax.random.normal(key, (2, 4, 16, 16), dtype=jnp.float32)
    y = jax.block_until_ready(leaky_relu(x, alpha))
    y_ref = jnp.where(x >= 0, x, x * jnp.asarray(alpha, x.dtype))
    assert y.shape == x.shape and y.dtype == x.dtype
    assert jnp.allclose(y, y_ref, atol=0, rtol=0)

    # bf16 + non-128-divisible size: exercises the dtype-aware quantum and the
    # ragged fallback path.
    xb = jax.random.normal(jax.random.PRNGKey(1), (3, 5, 7), dtype=jnp.bfloat16)
    yb = jax.block_until_ready(leaky_relu(xb, alpha))
    yb_ref = jnp.where(xb >= 0, xb, xb * jnp.asarray(alpha, xb.dtype))
    assert yb.shape == xb.shape and yb.dtype == xb.dtype
    assert jnp.allclose(yb.astype(jnp.float32), yb_ref.astype(jnp.float32), atol=0, rtol=0)

    print("KERNEL_OK")
</pallas_src>

<mosaic_0001>
module attributes {stable_mosaic.version = 11 : i64} {
  func.func @_leaky_relu_kernel_max(%arg0: i32, %arg1: memref<16x128xf32, #tpu.memory_space<vmem>>, %arg2: memref<16x128xf32, #tpu.memory_space<vmem>>) attributes {dimension_semantics = [#tpu.dimension_semantics<parallel>], iteration_bounds = array<i64: 1>, scalar_prefetch = 0 : i64, scratch_operands = 0 : i64, tpu.core_type = #tpu.core_type<tc>, window_params = [{transform_indices = @transform_0, window_bounds = array<i64: 16, 128>}, {transform_indices = @transform_1, window_bounds = array<i64: 16, 128>}]} {
    %c0 = arith.constant 0 : index
    %c0_0 = arith.constant 0 : index
    %0 = vector.load %arg1[%c0, %c0_0] : memref<16x128xf32, #tpu.memory_space<vmem>>, vector<16x128xf32>
    %cst = arith.constant 0.00999999977 : f32
    %1 = vector.broadcast %cst : f32 to vector<16x128xf32>
    %2 = arith.mulf %0, %1 : vector<16x128xf32>
    %3 = arith.maximumf %0, %2 : vector<16x128xf32>
    %c0_1 = arith.constant 0 : index
    %c0_2 = arith.constant 0 : index
    %4 = vector.load %arg2[%c0_1, %c0_2] : memref<16x128xf32, #tpu.memory_space<vmem>>, vector<16x128xf32>
    tpu.vector_store %arg2[%c0_1, %c0_2], %3 {strides = array<i32>} : memref<16x128xf32, #tpu.memory_space<vmem>>, vector<16x128xf32>,
    return
  }
  func.func @transform_0(%arg0: i32) -> (i32, i32) {
    %c0_i32 = arith.constant 0 : i32
    %c0_i32_0 = arith.constant 0 : i32
    return %arg0, %c0_i32 : i32, i32
  }
  func.func @transform_1(%arg0: i32) -> (i32, i32) {
    %c0_i32 = arith.constant 0 : i32
    %c0_i32_0 = arith.constant 0 : i32
    return %arg0, %c0_i32 : i32, i32
  }
}

</mosaic_0001>

<bundles_post_ra>
// kernel: tpu_custom_call.1
= control target key start
LH: loop header
LB: loop body
LE: loop exit
PB: predicated region body
PF: predicated region fallthrough
CT: control target
= control target key end

     0   :  { %6 = vsyncpa [#allocation3], 0  ;;  %s144_s0 = inlined_call_operand.hbm [shape: f32[16,128], index: 0, kind: input, shape index: {}]   ;;  %s145_s1 = inlined_call_operand.hbm [shape: f32[16,128], index: 1, kind: output, shape index: {}]  }
   0x1   :  { %7 = vsyncpa [#allocation4], 0  ;;  %s100_s6 = smov [#allocation2]   ;;  %s52_s10 = scalar_lea.hbm %s144_s0, 256 }
   0x2   :  { %s13_s7 = sshll.u32 %s100_s6, 4  ;;  %p53_p0 = scmp.ne.s32.totalorder %s144_s0, %s52_s10  ;;  %s14_s7 = int_to_ptr.vmem [resolvable:$true] %s13_s7 }
   0x3   :  { %p56_p1 = scmp.lt.u32.totalorder %s52_s10, %s144_s0 }
   0x5   :  { %p58_p2 = pnand %p56_p1, %p53_p0 }
   0x7   :  { %61 = shalt.err (!%p58_p2)
}
   0x8   :  { %s62_s15 = scalar_lea.vmem %s14_s7, 256  ;;  %p67_p4 = scmp.lt.s32.totalorder %s14_s7, %s14_s7 }
   0x9   :  { %p63_p3 = scmp.ne.s32.totalorder %s14_s7, %s62_s15  ;;  %p68_p5 = scmp.lt.s32.totalorder %s62_s15, %s62_s15 }
   0xb   :  { %p69_p6 = por %p68_p5, %p67_p4 }
   0xd   :  { %p70_p7 = pnand %p69_p6, %p63_p3 }
   0xf   :  { %73 = shalt.err (!%p70_p7)
}
  0x10   :  { %s101_s16 = smov 128   ;;  %s102_s17 = smov 8  }
  0x11   :  { %19 = dma.hbm_to_vmem [thread:$0]  %s144_s0, 256, %s14_s7, [#allocation3], %s101_s16, %s101_s16, %s102_s17  }
  0x12   :  { %96 = dma.done.wait [#allocation3], 256  }
  0x13   :  { %97 = vsyncadd [#allocation3], 4294967040  ;;  %v23_v0 = vld [vmem:[#allocation2] sm:$0xff]  ;;  %v24_v1 = vld [vmem:[#allocation2 + $0x8] sm:$0xff]  ;;  %s103_s20 = smov [#allocation5]  }
  0x14   :  { %s36_s21 = sshll.u32 %s103_s20, 4  ;;  %v25_v2 = vmul.f32 0.01, %v23_v0  ;;  %v26_v3 = vmul.f32 0.01, %v24_v1  ;;  %s37_s21 = int_to_ptr.vmem [resolvable:$true] %s36_s21 }
  0x15   :  { %s74_s22 = scalar_lea.vmem %s37_s21, 256  ;;  %p79_p9 = scmp.lt.s32.totalorder %s37_s21, %s37_s21 }
  0x16   :  { %v27_v4 = vmax.f32 %v23_v0, %v25_v2  ;;  %v28_v5 = vmax.f32 %v24_v1, %v26_v3  ;;  %p75_p8 = scmp.ne.s32.totalorder %s37_s21, %s74_s22  ;;  %p80_p10 = scmp.lt.s32.totalorder %s74_s22, %s74_s22 }
  0x18   :  { %29 = vst [vmem:[#allocation5] sm:$0xff] %v27_v4  ;;  %30 = vst [vmem:[#allocation5 + $0x8] sm:$0xff] %v28_v5  ;;  %p81_p11 = por %p80_p10, %p79_p9 }
  0x1a   :  { %p82_p12 = pnand %p81_p11, %p75_p8 }
  0x1c   :  { %85 = shalt.err (!%p82_p12)
}
  0x1d   :  { %s86_s24 = scalar_lea.hbm %s145_s1, 256 }
  0x1e   :  { %p87_p13 = scmp.ne.s32.totalorder %s145_s1, %s86_s24  ;;  %p90_p0 = scmp.lt.u32.totalorder %s86_s24, %s145_s1 }
  0x20   :  { %p92_p1 = pnand %p90_p0, %p87_p13 }
  0x22   :  { %95 = shalt.err (!%p92_p1)
}
  0x23   :  { %42 = dma.vmem_to_hbm [thread:$0]  %s37_s21, 256, %s145_s1, [#allocation4], %s101_s16, %s101_s16, %s102_s17  }
  0x24   :  { %98 = dma.done.wait [#allocation4], 256  }
  0x25   :  { %99 = vsyncadd [#allocation4], 4294967040 }
  0x26   :  { %46 = vsyncpa [#allocation3], 1 }
  0x27   :  { %47 = vsyncpa [#allocation4], 1 }

</bundles_post_ra>
